<compile_context>
chip_gen: v5e
topology: v5e:2x2
jax: 0.10.0
libtpu: 0.0.40
codegen_flags: <defaults>
</compile_context>

<pallas_src>
import functools

import jax
import jax.numpy as jnp
from jax.experimental import pallas as pl
from jax.experimental.pallas import tpu as pltpu


def _tv_partial_sum_kernel(x_ref, out_ref, *, n_rows, block_rows, hw, w):
    """x_ref: (block_rows, hw) tile; out_ref: (1, 1, hw) partial sums."""
    x = x_ref[...].astype(jnp.float32)  # (block_rows, hw)

    # Shift by +1 along H == shift by +W in the flattened H*W axis;
    # shift by +1 along W == shift by +1.  pltpu.roll follows jnp.roll
    # semantics with non-negative shift, so use the positive equivalents.
    dh = pltpu.roll(x, shift=hw - w, axis=1) - x  # x[h+1, w] - x[h, w]
    dw = pltpu.roll(x, shift=hw - 1, axis=1) - x  # x[h, w+1] - x[h, w]

    # Replicate padding makes the boundary *difference* exactly zero, so
    # mask the diff (not the shifted value) at the last row / last column.
    col = jax.lax.broadcasted_iota(jnp.int32, (block_rows, hw), 1)
    dh = jnp.where(col >= hw - w, 0.0, dh)      # last H row of each slab
    dw = jnp.where(col % w == w - 1, 0.0, dw)   # last W column of each row

    t = jnp.sqrt(dh * dh + dw * dw + jnp.float32(1e-6))

    # Mask tail rows of a partial final block (avoid the sqrt(1e-6) bias).
    if n_rows % block_rows != 0:
        row = (jax.lax.broadcasted_iota(jnp.int32, (block_rows, 1), 0)
               + pl.program_id(0) * block_rows)
        t = jnp.where(row < n_rows, t, 0.0)

    # Sublane-only reduce; cross-lane reduction deferred to the wrapper.
    out_ref[...] = jnp.sum(t, axis=0, keepdims=True).reshape(1, 1, hw)


def _choose_block_rows(n, hw, itemsize, target_bytes=4 * 1024 * 1024):
    """Pick rows-per-block so one input buffer is ~target_bytes."""
    tn = target_bytes // max(1, hw * itemsize)
    if tn >= n:
        return n                      # single block: block dim == array dim
    tn = max(8, (tn // 8) * 8)        # keep sublane dim a multiple of 8
    return min(tn, n)


def tv_loss(x, tvloss_weight=1.0):
    """x: [B, C, D, H, W] float array. Returns scalar float32 (mean TV term)."""
    del tvloss_weight  # not applied in the reference forward pass
    B, C, D, H, W = x.shape
    N = B * C * D
    HW = H * W
    x_flat = x.reshape(N, HW)  # layout-preserving; lane-dense last dim

    TN = _choose_block_rows(N, HW, jnp.dtype(x.dtype).itemsize)
    num_blocks = pl.cdiv(N, TN)

    kernel = functools.partial(
        _tv_partial_sum_kernel, n_rows=N, block_rows=TN, hw=HW, w=W)

    partials = pl.pallas_call(
        kernel,
        out_shape=jax.ShapeDtypeStruct((num_blocks, 1, HW), jnp.float32),
        grid_spec=pltpu.PrefetchScalarGridSpec(
            num_scalar_prefetch=0,
            grid=(num_blocks,),
            in_specs=[pl.BlockSpec((TN, HW), lambda i: (i, 0))],
            out_specs=pl.BlockSpec((1, 1, HW), lambda i: (i, 0, 0)),
        ),
        compiler_params=pltpu.CompilerParams(
            dimension_semantics=("parallel",),
        ),
    )(x_flat)

    total = jnp.sum(partials, dtype=jnp.float32)
    return (total / jnp.float32(N * HW)).astype(jnp.float32)


if __name__ == "__main__":
    key = jax.random.PRNGKey(0)
    B, C, D, H, W = 2, 4, 3, 16, 16
    x = jax.random.normal(key, (B, C, D, H, W), dtype=jnp.float32)

    out = tv_loss(x)
    jax.block_until_ready(out)

    # pure-JAX reference for sanity
    h_delta = jnp.concatenate([x[:, :, :, 1:, :], x[:, :, :, -1:, :]], axis=3)
    w_delta = jnp.concatenate([x[:, :, :, :, 1:], x[:, :, :, :, -1:]], axis=4)
    ref = jnp.sqrt((h_delta - x) ** 2 + (w_delta - x) ** 2 + 1e-6).mean()
    assert jnp.allclose(out, ref, rtol=1e-5, atol=1e-6), (out, ref)

    print("KERNEL_OK")
</pallas_src>

<mosaic_0001>
module attributes {stable_mosaic.version = 11 : i64} {
  func.func @_tv_partial_sum_kernel(%arg0: i32, %arg1: memref<24x256xf32, #tpu.memory_space<vmem>>, %arg2: memref<1x1x256xf32, #tpu.memory_space<vmem>>) attributes {dimension_semantics = [#tpu.dimension_semantics<parallel>], iteration_bounds = array<i64: 1>, scalar_prefetch = 0 : i64, scratch_operands = 0 : i64, tpu.core_type = #tpu.core_type<tc>, window_params = [{transform_indices = @transform_0, window_bounds = array<i64: 24, 256>}, {transform_indices = @transform_1, window_bounds = array<i64: 1, 1, 256>}]} {
    %c0 = arith.constant 0 : index
    %c0_0 = arith.constant 0 : index
    %0 = vector.load %arg1[%c0, %c0_0] : memref<24x256xf32, #tpu.memory_space<vmem>>, vector<24x256xf32>
    %c240_i32 = arith.constant 240 : i32
    %1 = tpu.dynamic_rotate %0 by %c240_i32 dim 1 : vector<24x256xf32>, i32 -> vector<24x256xf32>
    %2 = arith.subf %1, %0 : vector<24x256xf32>
    %c255_i32 = arith.constant 255 : i32
    %3 = tpu.dynamic_rotate %0 by %c255_i32 dim 1 : vector<24x256xf32>, i32 -> vector<24x256xf32>
    %4 = arith.subf %3, %0 : vector<24x256xf32>
    %5 = tpu.iota {dimensions = array<i32: 1>} : vector<24x256xi32>
    %c240_i32_1 = arith.constant 240 : i32
    %6 = vector.broadcast %c240_i32_1 : i32 to vector<24x256xi32>
    %7 = arith.cmpi sge, %5, %6 : vector<24x256xi32>
    %cst = arith.constant 0.000000e+00 : f32
    %8 = vector.broadcast %cst : f32 to vector<24x256xf32>
    %9 = arith.select %7, %8, %2 : vector<24x256xi1>, vector<24x256xf32>
    %c16_i32 = arith.constant 16 : i32
    %c0_i32 = arith.constant 0 : i32
    %10 = arith.cmpi eq, %c16_i32, %c0_i32 : i32
    %c1_i32 = arith.constant 1 : i32
    %11 = arith.select %10, %c1_i32, %c16_i32 : i32
    %12 = vector.broadcast %11 : i32 to vector<24x256xi32>
    %13 = arith.remsi %5, %12 : vector<24x256xi32>
    %c0_i32_2 = arith.constant 0 : i32
    %14 = vector.broadcast %c0_i32_2 : i32 to vector<24x256xi32>
    %15 = arith.cmpi ne, %13, %14 : vector<24x256xi32>
    %c0_i32_3 = arith.constant 0 : i32
    %16 = vector.broadcast %c0_i32_3 : i32 to vector<24x256xi32>
    %17 = arith.cmpi slt, %13, %16 : vector<24x256xi32>
    %c0_i32_4 = arith.constant 0 : i32
    %18 = arith.cmpi slt, %11, %c0_i32_4 : i32
    %19 = vector.broadcast %18 : i1 to vector<24x256xi1>
    %20 = vector.broadcast %19 : vector<24x256xi1> to vector<24x256xi1>
    %21 = arith.xori %17, %20 : vector<24x256xi1>
    %22 = arith.andi %21, %15 : vector<24x256xi1>
    %23 = vector.broadcast %11 : i32 to vector<24x256xi32>
    %24 = arith.addi %13, %23 : vector<24x256xi32>
    %25 = arith.select %22, %24, %13 : vector<24x256xi1>, vector<24x256xi32>
    %c15_i32 = arith.constant 15 : i32
    %26 = vector.broadcast %c15_i32 : i32 to vector<24x256xi32>
    %27 = arith.cmpi eq, %25, %26 : vector<24x256xi32>
    %cst_5 = arith.constant 0.000000e+00 : f32
    %28 = vector.broadcast %cst_5 : f32 to vector<24x256xf32>
    %29 = arith.select %27, %28, %4 : vector<24x256xi1>, vector<24x256xf32>
    %30 = arith.mulf %9, %9 : vector<24x256xf32>
    %31 = arith.mulf %29, %29 : vector<24x256xf32>
    %32 = arith.addf %30, %31 : vector<24x256xf32>
    %cst_6 = arith.constant 9.99999997E-7 : f32
    %33 = vector.broadcast %cst_6 : f32 to vector<24x256xf32>
    %34 = arith.addf %32, %33 : vector<24x256xf32>
    %35 = math.sqrt %34 : vector<24x256xf32>
    %cst_7 = arith.constant dense<0.000000e+00> : vector<256xf32>
    %36 = vector.multi_reduction <add>, %35, %cst_7 [0] : vector<24x256xf32> to vector<256xf32>
    %37 = vector.shape_cast %36 : vector<256xf32> to vector<1x256xf32>
    %38 = vector.shape_cast %37 : vector<1x256xf32> to vector<1x1x256xf32>
    %c0_8 = arith.constant 0 : index
    %c0_9 = arith.constant 0 : index
    %c0_10 = arith.constant 0 : index
    %39 = vector.load %arg2[%c0_8, %c0_9, %c0_10] : memref<1x1x256xf32, #tpu.memory_space<vmem>>, vector<1x1x256xf32>
    tpu.vector_store %arg2[%c0_8, %c0_9, %c0_10], %38 {strides = array<i32>} : memref<1x1x256xf32, #tpu.memory_space<vmem>>, vector<1x1x256xf32>,
    return
  }
  func.func @transform_0(%arg0: i32) -> (i32, i32) {
    %c0_i32 = arith.constant 0 : i32
    %c0_i32_0 = arith.constant 0 : i32
    return %arg0, %c0_i32 : i32, i32
  }
  func.func @transform_1(%arg0: i32) -> (i32, i32, i32) {
    %c0_i32 = arith.constant 0 : i32
    %c0_i32_0 = arith.constant 0 : i32
    %c0_i32_1 = arith.constant 0 : i32
    return %arg0, %c0_i32, %c0_i32_0 : i32, i32, i32
  }
}

</mosaic_0001>

<bundles_post_ra>
// kernel: tpu_custom_call.1
= control target key start
LH: loop header
LB: loop body
LE: loop exit
PB: predicated region body
PF: predicated region fallthrough
CT: control target
= control target key end

     0   :  { %6 = vsyncpa [#allocation3], 0  ;;  %s498_s0 = inlined_call_operand.hbm [shape: f32[24,256], index: 0, kind: input, shape index: {}]   ;;  %s499_s1 = inlined_call_operand.hbm [shape: f32[1,1,256], index: 1, kind: output, shape index: {}]  }
   0x1   :  { %7 = vsyncpa [#allocation4], 0  ;;  %s12_s8 = sshll.u32 %s498_s0, 4  ;;  %s334_s9 = smov [#allocation2]   ;;  %s13_s8 = int_to_ptr.hbm [resolvable:$true] %s12_s8 }
   0x2   :  { %s14_s10 = sshll.u32 %s334_s9, 4  ;;  %s335_s11 = smov 256   ;;  %s15_s10 = int_to_ptr.vmem [resolvable:$true] %s14_s10 }
   0x3   :  { %s336_s12 = smov 16  }
   0x4   :  { %20 = dma.hbm_to_vmem [thread:$0]  %s13_s8, 768, %s15_s10, [#allocation3], %s335_s11, %s335_s11, %s336_s12  }
   0x5   :  { %330 = dma.done.wait [#allocation3], 768  }
   0x6   :  { %331 = vsyncadd [#allocation3], 4294966528  ;;  %v353_v0 = vld [vmem:[#allocation2 + $0x8] sm:$0xff]  ;;  %v355_v1 = vld [vmem:[#allocation2] sm:$0xff]  ;;  %s337_s13 = smov 112   ;;  %s338_s14 = smov 127   ;;  %v43_v7 = vlaneseq }
   0x7   :  { %37 = vrot.lane.b32.xlu1 %v353_v0, %s337_s13  ;;  %31 = vrot.lane.b32.xlu0 %v355_v1, %s337_s13  ;;  %v28_v2 = vld [vmem:[#allocation2 + $0x18] sm:$0xff]  ;;  %v27_v3 = vld [vmem:[#allocation2 + $0x10] sm:$0xff]  ;;  %v361_v4 = vld [vmem:[#allocation2 + $0x20] sm:$0xff]  ;;  %s339_s0 = smov [#allocation5]   ;;  %s254_s18 = sshll.u32 %s499_s1, 4  ;;  %s255_s18 = int_to_ptr.hbm [resolvable:$true] %s254_s18 }
   0x8   :  { %58 = vrot.lane.b32.xlu2 %v355_v1, %s338_s14  ;;  %v364_v5 = vld [vmem:[#allocation2 + $0x28] sm:$0xff]  ;;  %v370_v10 = vand.u32 127, %v43_v7  ;;  %s252_s15 = sshll.u32 %s339_s0, 4  ;;  %s253_s15 = int_to_ptr.vmem [resolvable:$true] %s252_s15 }
   0xa   :  { %vm45_vm0 = vcmp.lt.s32.totalorder %v370_v10, 112  ;;  %v374_v14 = vadd.s32 128, %v370_v10  ;;  %v96_v17 = vand.u32 15, %v370_v10  ;;  %vm70_vm2 = vcmp.lt.s32.totalorder %v370_v10, 127 }
   0xc   :  { %v103_v18 = vand.u32 15, %v374_v14  ;;  %vm85_vm1 = vcmp.ge.s32.totalorder %v374_v14, 240  ;;  %vm394_vm3 = vcmp.eq.s32.totalorder %v96_v17, 15 }
   0xe   :  { %vm398_vm4 = vcmp.eq.s32.totalorder %v103_v18, 15 }
   0xf   :  { %39 = vrot.lane.b32.xlu1 %v28_v2, %s337_s13  ;;  %33 = vrot.lane.b32.xlu0 %v27_v3, %s337_s13 }
  0x10   :  { %60 = vrot.lane.b32.xlu2 %v27_v3, %s338_s14 }
  0x17   :  { %66 = vrot.lane.b32.xlu1 %v28_v2, %s338_s14  ;;  %64 = vrot.lane.b32.xlu0 %v353_v0, %s338_s14 }
  0x18   :  { %35 = vrot.lane.b32.xlu2 %v361_v4, %s337_s13 }
  0x1f   :  { %62 = vrot.lane.b32.xlu1 %v361_v4, %s338_s14  ;;  %41 = vrot.lane.b32.xlu0 %v364_v5, %s337_s13 }
  0x20   :  { %68 = vrot.lane.b32.xlu2 %v364_v5, %s338_s14 }
  0x62   :  { %v59_v6 = vpop.permute.xlu2 %58 }
  0x6a   :  { %v61_v11 = vpop.permute.xlu2 %60 }
  0x72   :  { %v36_v23 = vpop.permute.xlu2 %35 }
  0x79   :  { %v38_v8 = vpop.permute.xlu1 %37  ;;  %v32_v9 = vpop.permute.xlu0 %31 }
  0x7a   :  { %v49_v15 = vsel %vm45_vm0, %v38_v8, %v32_v9  ;;  %v46_v19 = vsel %vm45_vm0, %v32_v9, %v38_v8  ;;  %v69_v52 = vpop.permute.xlu2 %68 }
  0x7b   :  { %v53_v20 = vsub.f32 %v49_v15, %v353_v0  ;;  %v52_v24 = vsub.f32 %v46_v19, %v355_v1 }
  0x7d   :  { %v87_v26 = vsel %vm85_vm1, 0.0, %v53_v20  ;;  %v124_v40 = vmul.f32 %v52_v24, %v52_v24 }
  0x7e   :  { %v125_v41 = vmul.f32 %v87_v26, %v87_v26 }
  0x81   :  { %v40_v12 = vpop.permute.xlu1 %39  ;;  %v34_v13 = vpop.permute.xlu0 %33 }
  0x82   :  { %v50_v16 = vsel %vm45_vm0, %v40_v12, %v34_v13  ;;  %v47_v21 = vsel %vm45_vm0, %v34_v13, %v40_v12 }
  0x83   :  { %v55_v22 = vsub.f32 %v50_v16, %v28_v2  ;;  %v54_v25 = vsub.f32 %v47_v21, %v27_v3 }
  0x85   :  { %v89_v27 = vsel %vm85_vm1, 0.0, %v55_v22  ;;  %v126_v42 = vmul.f32 %v54_v25, %v54_v25 }
  0x86   :  { %v127_v43 = vmul.f32 %v89_v27, %v89_v27 }
  0x89   :  { %v67_v30 = vpop.permute.xlu1 %66  ;;  %v65_v31 = vpop.permute.xlu0 %64 }
  0x8a   :  { %v72_v32 = vsel %vm70_vm2, %v61_v11, %v67_v30  ;;  %v75_v33 = vsel %vm70_vm2, %v67_v30, %v61_v11  ;;  %v71_v34 = vsel %vm70_vm2, %v59_v6, %v65_v31  ;;  %v74_v35 = vsel %vm70_vm2, %v65_v31, %v59_v6 }
  0x8b   :  { %v79_v36 = vsub.f32 %v72_v32, %v27_v3  ;;  %v80_v37 = vsub.f32 %v75_v33, %v28_v2  ;;  %v77_v38 = vsub.f32 %v71_v34, %v355_v1  ;;  %v78_v39 = vsub.f32 %v74_v35, %v353_v0 }
  0x8d   :  { %v120_v44 = vsel %vm394_vm3, 0.0, %v79_v36  ;;  %v121_v45 = vsel %vm398_vm4, 0.0, %v80_v37  ;;  %v118_v46 = vsel %vm394_vm3, 0.0, %v77_v38  ;;  %v119_v47 = vsel %vm398_vm4, 0.0, %v78_v39 }
  0x8e   :  { %v132_v48 = vmul.f32 %v120_v44, %v120_v44  ;;  %v133_v49 = vmul.f32 %v121_v45, %v121_v45  ;;  %v130_v50 = vmul.f32 %v118_v46, %v118_v46  ;;  %v131_v51 = vmul.f32 %v119_v47, %v119_v47 }
  0x90   :  { %v138_v53 = vadd.f32 %v132_v48, %v126_v42  ;;  %v139_v54 = vadd.f32 %v133_v49, %v127_v43  ;;  %v136_v55 = vadd.f32 %v130_v50, %v124_v40  ;;  %v137_v56 = vadd.f32 %v131_v51, %v125_v41 }
  0x91   :  { %v63_v57 = vpop.permute.xlu1 %62  ;;  %v42_v58 = vpop.permute.xlu0 %41 }
  0x92   :  { %v420_v59 = vadd.f32 1e-06, %v138_v53  ;;  %v422_v60 = vadd.f32 1e-06, %v139_v54  ;;  %v424_v61 = vadd.f32 1e-06, %v136_v55  ;;  %v73_v62 = vsel %vm70_vm2, %v63_v57, %v69_v52 }
  0x93   :  { %v428_v63 = vadd.f32 1e-06, %v137_v56  ;;  %v76_v0 = vsel %vm70_vm2, %v69_v52, %v63_v57  ;;  %v81_v1 = vsub.f32 %v73_v62, %v361_v4  ;;  %v48_v2 = vsel %vm45_vm0, %v36_v23, %v42_v58 }
  0x94   :  { %270 = vrsqrt.f32 %v420_v59  ;;  %v82_v3 = vsub.f32 %v76_v0, %v364_v5  ;;  %v51_v6 = vsel %vm45_vm0, %v42_v58, %v36_v23  ;;  %v56_v8 = vsub.f32 %v48_v2, %v361_v4 }
  0x95   :  { %272 = vrsqrt.f32 %v422_v60  ;;  %v122_v9 = vsel %vm394_vm3, 0.0, %v81_v1  ;;  %v57_v11 = vsub.f32 %v51_v6, %v364_v5  ;;  %vm155_vm5 = vcmp.eq.f32.partialorder %v424_v61, inf }
  0x96   :  { %274 = vrsqrt.f32 %v424_v61  ;;  %v123_v12 = vsel %vm398_vm4, 0.0, %v82_v3  ;;  %v134_v13 = vmul.f32 %v122_v9, %v122_v9  ;;  %v128_v15 = vmul.f32 %v56_v8, %v56_v8 }
  0x97   :  { %276 = vrsqrt.f32 %v428_v63  ;;  %v135_v10 = vmul.f32 %v123_v12, %v123_v12  ;;  %v91_v4 = vsel %vm85_vm1, 0.0, %v57_v11  ;;  %vm157_vm6 = vcmp.eq.f32.partialorder %v424_v61, 0.0 }
  0x98   :  { %v129_v16 = vmul.f32 %v91_v4, %v91_v4  ;;  %v140_v17 = vadd.f32 %v134_v13, %v128_v15  ;;  %v158_v53 = vand.u32 2147483648, %v424_v61  ;;  %vm179_vm7 = vcmp.eq.f32.partialorder %v420_v59, inf }
  0x99   :  { %vm167_vm8 = vcmp.eq.f32.partialorder %v428_v63, inf  ;;  %vm181_vm9 = vcmp.eq.f32.partialorder %v420_v59, 0.0  ;;  %v182_v62 = vand.u32 2147483648, %v420_v59  ;;  %vm191_vm10 = vcmp.eq.f32.partialorder %v422_v60, inf }
  0x9a   :  { %v271_v18 = vpop.eup %270  ;;  %v141_v19 = vadd.f32 %v135_v10, %v129_v16  ;;  %v450_v20 = vadd.f32 1e-06, %v140_v17  ;;  %v170_v8 = vand.u32 2147483648, %v428_v63  ;;  %v194_v11 = vand.u32 2147483648, %v422_v60 }
  0x9b   :  { %v273_v5 = vpop.eup %272  ;;  %v173_v21 = vmul.f32 %v271_v18, %v420_v59  ;;  %vm169_vm11 = vcmp.eq.f32.partialorder %v428_v63, 0.0  ;;  %vm193_vm12 = vcmp.eq.f32.partialorder %v422_v60, 0.0  ;;  %vm239_vm1 = vcmask 1040384  }
  0x9c   :  { %v275_v22 = vpop.eup %274  ;;  %v185_v23 = vmul.f32 %v273_v5, %v422_v60  ;;  %v454_v24 = vadd.f32 1e-06, %v141_v19  ;;  %278 = vrsqrt.f32 %v450_v20  ;;  %vm203_vm13 = vcmp.eq.f32.partialorder %v450_v20, inf }
  0x9d   :  { %v277_v25 = vpop.eup %276  ;;  %v149_v14 = vmul.f32 %v275_v22, %v424_v61  ;;  %v174_v26 = vmul.f32 %v271_v18, %v173_v21  ;;  %v206_v10 = vand.u32 2147483648, %v450_v20  ;;  %vm205_vm14 = vcmp.eq.f32.partialorder %v450_v20, 0.0 }
  0x9e   :  { %v161_v27 = vmul.f32 %v277_v25, %v428_v63  ;;  %280 = vrsqrt.f32 %v454_v24  ;;  %v186_v28 = vmul.f32 %v273_v5, %v185_v23  ;;  %vm215_vm15 = vcmp.eq.f32.partialorder %v454_v24, inf }
  0x9f   :  { %v150_v29 = vmul.f32 %v275_v22, %v149_v14  ;;  %v175_v30 = vmul.f32 0.5, %v174_v26  ;;  %vm217_vm0 = vcmp.eq.f32.partialorder %v454_v24, 0.0  ;;  %vm244_vm2 = vcmp.lt.s32.totalorder %v43_v7, 256 }
  0xa0   :  { %v162_v31 = vmul.f32 %v277_v25, %v161_v27  ;;  %v187_v32 = vmul.f32 0.5, %v186_v28 }
  0xa1   :  { %v151_v33 = vmul.f32 0.5, %v150_v29  ;;  %v176_v34 = vsub.f32 1.5, %v175_v30 }
  0xa2   :  { %v279_v35 = vpop.eup %278  ;;  %v163_v36 = vmul.f32 0.5, %v162_v31  ;;  %v188_v37 = vsub.f32 1.5, %v187_v32 }
  0xa3   :  { %v197_v38 = vmul.f32 %v279_v35, %v450_v20  ;;  %v152_v39 = vsub.f32 1.5, %v151_v33  ;;  %v177_v40 = vmul.f32 %v271_v18, %v176_v34 }
  0xa4   :  { %v281_v41 = vpop.eup %280  ;;  %v164_v42 = vsub.f32 1.5, %v163_v36  ;;  %v189_v43 = vmul.f32 %v273_v5, %v188_v37 }
  0xa5   :  { %v153_v44 = vmul.f32 %v275_v22, %v152_v39  ;;  %v178_v45 = vmul.f32 %v177_v40, %v420_v59  ;;  %v198_v46 = vmul.f32 %v279_v35, %v197_v38  ;;  %v209_v47 = vmul.f32 %v281_v41, %v454_v24 }
  0xa6   :  { %v165_v48 = vmul.f32 %v277_v25, %v164_v42  ;;  %v190_v50 = vmul.f32 %v189_v43, %v422_v60 }
  0xa7   :  { %v154_v49 = vmul.f32 %v153_v44, %v424_v61  ;;  %v199_v51 = vmul.f32 0.5, %v198_v46  ;;  %v210_v52 = vmul.f32 %v281_v41, %v209_v47  ;;  %v180_v56 = vsel %vm179_vm7, %v420_v59, %v178_v45 }
  0xa8   :  { %v166_v54 = vmul.f32 %v165_v48, %v428_v63  ;;  %v192_v1 = vsel %vm191_vm10, %v422_v60, %v190_v50  ;;  %v183_v9 = vsel %vm181_vm9, %v182_v62, %v180_v56  ;;  %v218_v60 = vand.u32 2147483648, %v454_v24 }
  0xa9   :  { %v156_v55 = vsel %vm155_vm5, %v424_v61, %v154_v49  ;;  %v200_v57 = vsub.f32 1.5, %v199_v51  ;;  %v211_v58 = vmul.f32 0.5, %v210_v52  ;;  %v195_v15 = vsel %vm193_vm12, %v194_v11, %v192_v1 }
  0xaa   :  { %v168_v0 = vsel %vm167_vm8, %v428_v63, %v166_v54  ;;  %v159_v6 = vsel %vm157_vm6, %v158_v53, %v156_v55 }
  0xab   :  { %v201_v2 = vmul.f32 %v279_v35, %v200_v57  ;;  %v212_v3 = vsub.f32 1.5, %v211_v58  ;;  %v171_v13 = vsel %vm169_vm11, %v170_v8, %v168_v0  ;;  %v220_v16 = vadd.f32 %v183_v9, %v159_v6 }
  0xac   :  { %v228_v19 = vadd.f32 %v195_v15, %v171_v13 }
  0xad   :  { %v202_v59 = vmul.f32 %v201_v2, %v450_v20  ;;  %v213_v12 = vmul.f32 %v281_v41, %v212_v3 }
  0xaf   :  { %v204_v61 = vsel %vm203_vm13, %v450_v20, %v202_v59  ;;  %v214_v4 = vmul.f32 %v213_v12, %v454_v24 }
  0xb0   :  { %v207_v17 = vsel %vm205_vm14, %v206_v10, %v204_v61 }
  0xb1   :  { %v216_v63 = vsel %vm215_vm15, %v454_v24, %v214_v4  ;;  %v221_v18 = vadd.f32 %v220_v16, %v207_v17 }
  0xb2   :  { %v219_v5 = vsel %vm217_vm0, %v218_v60, %v216_v63 }
  0xb3   :  { %v222_v21 = vrot.slane %v221_v18, 4  ;;  %v229_v22 = vadd.f32 %v228_v19, %v219_v5 }
  0xb5   :  { %v223_v23 = vadd.f32 %v222_v21, %v221_v18  ;;  %v230_v25 = vrot.slane %v229_v22, 4 }
  0xb7   :  { %v224_v20 = vrot.slane %v223_v23, 2  ;;  %v231_v14 = vadd.f32 %v230_v25, %v229_v22 }
  0xb9   :  { %v225_v26 = vadd.f32 %v224_v20, %v223_v23  ;;  %v232_v27 = vrot.slane %v231_v14, 2 }
  0xbb   :  { %v233_v28 = vadd.f32 %v232_v27, %v231_v14  ;;  %v226_v29 = vrot.slane %v225_v26, 1 }
  0xbd   :  { %v234_v30 = vrot.slane %v233_v28, 1  ;;  %v227_v24 = vadd.f32 %v226_v29, %v225_v26 }
  0xbf   :  { %v235_v31 = vadd.f32 %v234_v30, %v233_v28 }
  0xc1   :  { %v238_v32 = vrot.slane %v235_v31, 7 }
  0xc3   :  { %v240_v33 = vsel %vm239_vm1, %v227_v24, %v238_v32 }
  0xc4   :  { %246 = vst.msk [vmem:[#allocation5] sm:$0x3] %vm244_vm2, %v240_v33 }
  0xc5   :  { %257 = dma.vmem_to_hbm [thread:$0]  %s253_s15, 32, %s255_s18, [#allocation4]  }
  0xc6   :  { %332 = dma.done.wait [#allocation4], 32  }
  0xc7   :  { %333 = vsyncadd [#allocation4], 4294967264 }
  0xc8   :  { %262 = vsyncpa [#allocation3], 1 }
  0xc9   :  { %263 = vsyncpa [#allocation4], 1 }

</bundles_post_ra>
